<compile_context>
chip_gen: v6e
topology: v6e:2x2x1
jax: 0.10.0
libtpu: 0.0.40
codegen_flags: <defaults>
</compile_context>

<pallas_src>
import functools

import jax
import jax.numpy as jnp
from jax.experimental import pallas as pl
from jax.experimental.pallas import tpu as pltpu


def _smatrix_kernel(u_ref, vt_ref, adj_ref, mrow_ref, mcol_ref, out_ref,
                    *, p_Asem):
    # u_ref:    (1, TI, 1)   x[i] @ w1 + bias   (rows of this tile)
    # vt_ref:   (1, 1,  S)   x[j] @ w2          (all columns, pre-transposed)
    # adj_ref:  (1, TI, S)   native dtype (cast to f32 in-kernel)
    # mrow_ref: (1, TI, 1)   mask rows
    # mcol_ref: (1, 1,  S)   mask columns
    # out_ref:  (1, TI, S)
    score = u_ref[0] + vt_ref[0]                       # (TI, S) via broadcast
    xij = jax.nn.sigmoid(score)                        # EUP, f32

    adj = adj_ref[0].astype(jnp.float32)               # cast after DMA
    a_esm = p_Asem * xij + (1.0 - p_Asem) * adj        # (TI, S)

    invalid = jnp.logical_or(mrow_ref[0] == 0.0, mcol_ref[0] == 0.0)  # (TI, S)
    out_ref[0] = jnp.where(invalid, jnp.float32(1e-9), a_esm).astype(out_ref.dtype)


def _pick_tile_i(S, max_tile=512):
    """Row-tile size: lane dim stays the full S; sublane tile multiple of 8."""
    if S <= max_tile:
        return S
    for t in range(max_tile, 7, -8):          # prefer an exact divisor of S
        if S % t == 0:
            return t
    return max_tile                            # ragged last tile is fine


def sentence_matrix_layer(x, adj, mask, weight, bias, p_Asem=0.6, tile_i=None):
    """x: (B,S,H), adj: (B,S,S) any float dtype, mask: (B,S), weight: (1,2H),
    bias: (1,). Returns (B,S,S) float32."""
    B, S, H = x.shape
    assert adj.shape == (B, S, S)
    assert mask.shape == (B, S)

    # --- hoisted tiny matmuls (plain XLA, negligible HBM traffic) -----------
    xf = x.astype(jnp.float32)
    w = weight.astype(jnp.float32)
    w1 = w[0, :H][:, None]                                   # (H, 1)
    w2 = w[0, H:][:, None]                                   # (H, 1)
    b0 = bias.astype(jnp.float32)[0]
    u = (jnp.einsum('bsh,ho->bso', xf, w1,
                    preferred_element_type=jnp.float32) + b0)        # (B, S, 1)
    vt = jnp.einsum('bsh,ho->bso', xf, w2,
                    preferred_element_type=jnp.float32).reshape(B, 1, S)

    mask_f = mask.astype(jnp.float32)
    m_row = mask_f.reshape(B, S, 1)
    m_col = mask_f.reshape(B, 1, S)

    # --- tiling --------------------------------------------------------------
    TI = int(tile_i) if tile_i is not None else _pick_tile_i(S)
    grid = (B, pl.cdiv(S, TI))

    adj_bytes = jnp.dtype(adj.dtype).itemsize
    out_bytes = 4
    # double-buffered adj + out blocks dominate VMEM
    vmem_need = 2 * TI * S * (adj_bytes + out_bytes) + 4 * (TI + S) * 4 * 2
    vmem_limit = None
    if vmem_need > 30 * 1024 * 1024:
        vmem_limit = min(int(vmem_need * 3 // 2), 100 * 1024 * 1024)

    cost = pl.CostEstimate(
        flops=6 * B * S * S,
        transcendentals=B * S * S,                 # sigmoid
        bytes_accessed=B * S * S * (adj_bytes + out_bytes) + 4 * B * S * 4,
    )

    kernel = functools.partial(_smatrix_kernel, p_Asem=float(p_Asem))

    return pl.pallas_call(
        kernel,
        out_shape=jax.ShapeDtypeStruct((B, S, S), jnp.float32),
        grid=grid,
        in_specs=[
            pl.BlockSpec((1, TI, 1), lambda b, i: (b, i, 0)),   # u
            pl.BlockSpec((1, 1, S), lambda b, i: (b, 0, 0)),    # vT
            pl.BlockSpec((1, TI, S), lambda b, i: (b, i, 0)),   # adj (native dtype)
            pl.BlockSpec((1, TI, 1), lambda b, i: (b, i, 0)),   # mask rows
            pl.BlockSpec((1, 1, S), lambda b, i: (b, 0, 0)),    # mask cols
        ],
        out_specs=pl.BlockSpec((1, TI, S), lambda b, i: (b, i, 0)),
        compiler_params=pltpu.CompilerParams(
            dimension_semantics=("parallel", "parallel"),
            vmem_limit_bytes=vmem_limit,
        ),
        cost_estimate=cost,
    )(u, vt, adj, m_row, m_col)


def _reference(x, adj, mask, weight, bias, p_Asem=0.6):
    # Pure-JAX reference mirroring the PyTorch forward exactly.
    B, S, H = x.shape
    xi = jnp.broadcast_to(x[:, :, None, :], (B, S, S, H)).astype(jnp.float32)
    xj = jnp.broadcast_to(x[:, None, :, :], (B, S, S, H)).astype(jnp.float32)
    xij = jnp.concatenate([xi, xj], axis=-1) @ weight[0].astype(jnp.float32) \
        + bias.astype(jnp.float32)[0]
    xij = jax.nn.sigmoid(xij)                                   # (B, S, S)
    a_esm = p_Asem * xij + (1.0 - p_Asem) * adj.astype(jnp.float32)
    mask_i = jnp.broadcast_to(mask[:, None, :], (B, S, S))
    mask_j = jnp.broadcast_to(mask[:, :, None], (B, S, S))
    a_mask = mask_i * mask_j
    return jnp.where(a_mask == 0, 1e-9, a_esm)


if __name__ == "__main__":
    p_Asem = 0.6
    key = jax.random.PRNGKey(0)

    # ---- test 1: tiny demo shape (single tile per batch) --------------------
    B, S, H = 2, 8, 32
    kx, kadj, kmask, kw, kb, key = jax.random.split(key, 6)
    x = jax.random.normal(kx, (B, S, H), dtype=jnp.float32)
    adj = jax.random.uniform(kadj, (B, S, S), dtype=jnp.float32)
    mask = (jax.random.uniform(kmask, (B, S)) > 0.3).astype(jnp.float32)
    bound = 1.0 / (2 * H) ** 0.5
    weight = jax.random.uniform(kw, (1, 2 * H), minval=-bound, maxval=bound,
                                dtype=jnp.float32)
    bias = jax.random.uniform(kb, (1,), minval=-bound, maxval=bound,
                              dtype=jnp.float32)

    out = jax.block_until_ready(
        sentence_matrix_layer(x, adj, mask, weight, bias, p_Asem))
    ref = _reference(x, adj, mask, weight, bias, p_Asem)
    assert out.shape == (B, S, S)
    assert jnp.allclose(out, ref, atol=1e-5, rtol=1e-5), "mismatch (small shape)"

    # ---- test 2: exercise the row-tiled grid path ----------------------------
    B2, S2, H2 = 2, 128, 64
    kx, kadj, kmask, kw, kb, key = jax.random.split(key, 6)
    x2 = jax.random.normal(kx, (B2, S2, H2), dtype=jnp.float32)
    adj2 = jax.random.uniform(kadj, (B2, S2, S2), dtype=jnp.float32)
    mask2 = (jax.random.uniform(kmask, (B2, S2)) > 0.3).astype(jnp.float32)
    bound2 = 1.0 / (2 * H2) ** 0.5
    weight2 = jax.random.uniform(kw, (1, 2 * H2), minval=-bound2, maxval=bound2,
                                 dtype=jnp.float32)
    bias2 = jax.random.uniform(kb, (1,), minval=-bound2, maxval=bound2,
                               dtype=jnp.float32)

    out2 = jax.block_until_ready(
        sentence_matrix_layer(x2, adj2, mask2, weight2, bias2, p_Asem,
                              tile_i=32))                 # 4 row tiles per batch
    ref2 = _reference(x2, adj2, mask2, weight2, bias2, p_Asem)
    assert out2.shape == (B2, S2, S2)
    assert jnp.allclose(out2, ref2, atol=1e-5, rtol=1e-5), "mismatch (tiled shape)"

    print("KERNEL_OK")
</pallas_src>

<mosaic_0001>
module attributes {stable_mosaic.version = 11 : i64} {
  func.func @_smatrix_kernel(%arg0: i32, %arg1: i32, %arg2: memref<1x8x1xf32, #tpu.memory_space<vmem>>, %arg3: memref<1x1x8xf32, #tpu.memory_space<vmem>>, %arg4: memref<1x8x8xf32, #tpu.memory_space<vmem>>, %arg5: memref<1x8x1xf32, #tpu.memory_space<vmem>>, %arg6: memref<1x1x8xf32, #tpu.memory_space<vmem>>, %arg7: memref<1x8x8xf32, #tpu.memory_space<vmem>>) attributes {dimension_semantics = [#tpu.dimension_semantics<parallel>, #tpu.dimension_semantics<parallel>], iteration_bounds = array<i64: 2, 1>, scalar_prefetch = 0 : i64, scratch_operands = 0 : i64, tpu.core_type = #tpu.core_type<tc>, window_params = [{transform_indices = @transform_0, window_bounds = array<i64: 1, 8, 1>}, {transform_indices = @transform_1, window_bounds = array<i64: 1, 1, 8>}, {transform_indices = @transform_2, window_bounds = array<i64: 1, 8, 8>}, {transform_indices = @transform_3, window_bounds = array<i64: 1, 8, 1>}, {transform_indices = @transform_4, window_bounds = array<i64: 1, 1, 8>}, {transform_indices = @transform_5, window_bounds = array<i64: 1, 8, 8>}]} {
    %c0 = arith.constant 0 : index
    %c0_0 = arith.constant 0 : index
    %c0_1 = arith.constant 0 : index
    %0 = vector.load %arg2[%c0, %c0_0, %c0_1] : memref<1x8x1xf32, #tpu.memory_space<vmem>>, vector<1x8x1xf32>
    %1 = vector.shape_cast %0 : vector<1x8x1xf32> to vector<8x1xf32>
    %c0_2 = arith.constant 0 : index
    %c0_3 = arith.constant 0 : index
    %c0_4 = arith.constant 0 : index
    %2 = vector.load %arg3[%c0_2, %c0_3, %c0_4] : memref<1x1x8xf32, #tpu.memory_space<vmem>>, vector<1x1x8xf32>
    %3 = vector.shape_cast %2 : vector<1x1x8xf32> to vector<1x8xf32>
    %4 = vector.broadcast %1 : vector<8x1xf32> to vector<8x8xf32>
    %5 = vector.broadcast %3 : vector<1x8xf32> to vector<8x8xf32>
    %6 = arith.addf %4, %5 : vector<8x8xf32>
    %7 = arith.negf %6 : vector<8x8xf32>
    %8 = math.exp %7 : vector<8x8xf32>
    %cst = arith.constant 1.000000e+00 : f32
    %9 = vector.broadcast %cst : f32 to vector<8x8xf32>
    %10 = arith.addf %9, %8 : vector<8x8xf32>
    %11 = arith.divf %9, %10 : vector<8x8xf32>
    %c0_5 = arith.constant 0 : index
    %c0_6 = arith.constant 0 : index
    %c0_7 = arith.constant 0 : index
    %12 = vector.load %arg4[%c0_5, %c0_6, %c0_7] : memref<1x8x8xf32, #tpu.memory_space<vmem>>, vector<1x8x8xf32>
    %13 = vector.shape_cast %12 : vector<1x8x8xf32> to vector<8x8xf32>
    %cst_8 = arith.constant 6.000000e-01 : f32
    %14 = vector.broadcast %cst_8 : f32 to vector<8x8xf32>
    %15 = arith.mulf %14, %11 : vector<8x8xf32>
    %cst_9 = arith.constant 4.000000e-01 : f32
    %16 = vector.broadcast %cst_9 : f32 to vector<8x8xf32>
    %17 = arith.mulf %16, %13 : vector<8x8xf32>
    %18 = arith.addf %15, %17 : vector<8x8xf32>
    %c0_10 = arith.constant 0 : index
    %c0_11 = arith.constant 0 : index
    %c0_12 = arith.constant 0 : index
    %19 = vector.load %arg5[%c0_10, %c0_11, %c0_12] : memref<1x8x1xf32, #tpu.memory_space<vmem>>, vector<1x8x1xf32>
    %20 = vector.shape_cast %19 : vector<1x8x1xf32> to vector<8x1xf32>
    %cst_13 = arith.constant 0.000000e+00 : f32
    %21 = vector.broadcast %cst_13 : f32 to vector<8x1xf32>
    %22 = arith.cmpf oeq, %20, %21 : vector<8x1xf32>
    %c0_14 = arith.constant 0 : index
    %c0_15 = arith.constant 0 : index
    %c0_16 = arith.constant 0 : index
    %23 = vector.load %arg6[%c0_14, %c0_15, %c0_16] : memref<1x1x8xf32, #tpu.memory_space<vmem>>, vector<1x1x8xf32>
    %24 = vector.shape_cast %23 : vector<1x1x8xf32> to vector<1x8xf32>
    %cst_17 = arith.constant 0.000000e+00 : f32
    %25 = vector.broadcast %cst_17 : f32 to vector<1x8xf32>
    %26 = arith.cmpf oeq, %24, %25 : vector<1x8xf32>
    %27 = vector.broadcast %22 : vector<8x1xi1> to vector<8x8xi1>
    %28 = vector.broadcast %26 : vector<1x8xi1> to vector<8x8xi1>
    %29 = arith.ori %27, %28 : vector<8x8xi1>
    %cst_18 = arith.constant 9.99999971E-10 : f32
    %30 = vector.broadcast %cst_18 : f32 to vector<8x8xf32>
    %31 = arith.select %29, %30, %18 : vector<8x8xi1>, vector<8x8xf32>
    %c0_19 = arith.constant 0 : index
    %c0_20 = arith.constant 0 : index
    %c0_21 = arith.constant 0 : index
    %32 = vector.load %arg7[%c0_19, %c0_20, %c0_21] : memref<1x8x8xf32, #tpu.memory_space<vmem>>, vector<1x8x8xf32>
    %33 = vector.shape_cast %32 : vector<1x8x8xf32> to vector<8x8xf32>
    %34 = vector.shape_cast %31 : vector<8x8xf32> to vector<1x8x8xf32>
    tpu.vector_store %arg7[%c0_19, %c0_20, %c0_21], %34 {strides = array<i32>} : memref<1x8x8xf32, #tpu.memory_space<vmem>>, vector<1x8x8xf32>,
    return
  }
  func.func @transform_0(%arg0: i32, %arg1: i32) -> (i32, i32, i32) {
    %c0_i32 = arith.constant 0 : i32
    %c0_i32_0 = arith.constant 0 : i32
    return %arg0, %arg1, %c0_i32 : i32, i32, i32
  }
  func.func @transform_1(%arg0: i32, %arg1: i32) -> (i32, i32, i32) {
    %c0_i32 = arith.constant 0 : i32
    %c0_i32_0 = arith.constant 0 : i32
    %c0_i32_1 = arith.constant 0 : i32
    return %arg0, %c0_i32, %c0_i32_0 : i32, i32, i32
  }
  func.func @transform_2(%arg0: i32, %arg1: i32) -> (i32, i32, i32) {
    %c0_i32 = arith.constant 0 : i32
    %c0_i32_0 = arith.constant 0 : i32
    return %arg0, %arg1, %c0_i32 : i32, i32, i32
  }
  func.func @transform_3(%arg0: i32, %arg1: i32) -> (i32, i32, i32) {
    %c0_i32 = arith.constant 0 : i32
    %c0_i32_0 = arith.constant 0 : i32
    return %arg0, %arg1, %c0_i32 : i32, i32, i32
  }
  func.func @transform_4(%arg0: i32, %arg1: i32) -> (i32, i32, i32) {
    %c0_i32 = arith.constant 0 : i32
    %c0_i32_0 = arith.constant 0 : i32
    %c0_i32_1 = arith.constant 0 : i32
    return %arg0, %c0_i32, %c0_i32_0 : i32, i32, i32
  }
  func.func @transform_5(%arg0: i32, %arg1: i32) -> (i32, i32, i32) {
    %c0_i32 = arith.constant 0 : i32
    %c0_i32_0 = arith.constant 0 : i32
    return %arg0, %arg1, %c0_i32 : i32, i32, i32
  }
}

</mosaic_0001>

<bundles_post_ra>
// kernel: tpu_custom_call.1
= control target key start
LH: loop header
LB: loop body
LE: loop exit
PB: predicated region body
PF: predicated region fallthrough
CT: control target
= control target key end

     0   :  { %10 = vsyncpa [#allocation3], 0  ;;  %s809_s0 = inlined_call_operand.vmem [shape: f32[2,8,1], index: 0, kind: input, shape index: {}]   ;;  %s810_s1 = inlined_call_operand.vmem [shape: f32[2,1,8], index: 1, kind: input, shape index: {}]   ;;  %s811_s2 = inlined_call_operand.vmem [shape: f32[2,8,8], index: 2, kind: input, shape index: {}]   ;;  %s812_s3 = inlined_call_operand.vmem [shape: f32[2,8,1], index: 3, kind: input, shape index: {}]   ;;  %s813_s4 = inlined_call_operand.vmem [shape: f32[2,1,8], index: 4, kind: input, shape index: {}]   ;;  %s814_s5 = inlined_call_operand.hbm [shape: f32[2,8,8], index: 5, kind: output, shape index: {}]  }
   0x1   :  { %12 = vsyncpa [#allocation3 + $0x1], 0  ;;  %s692_s18 = smov 0   ;;  %s694_s19 = smov 0  }
   0x2   :  { %s696_s20 = smov 0   ;;  %s698_s21 = smov 0  }
   0x3   :  { %s700_s22 = smov 0   ;;  %s702_s23 = smov 0  }
   0x4 LB: > { %s506_s24 = sadd.s32 4294967295, %s658_s23   ;;  %s507_s25 = sadd.s32 4294967294, %s658_s23   ;;  %s658_s23 = sphi %s702_s23, %s18_s23   ;;  %s654_s22 = sphi %s700_s22, %s821_s22   ;;  %s650_s21 = sphi %s698_s21, %s820_s21   ;;  %s646_s20 = sphi %s696_s20, %s819_s20   ;;  %s642_s19 = sphi %s694_s19, %s818_s19   ;;  %s638_s18 = sphi %s692_s18, %s817_s18  }
   0x5   : > { %s30_s26 = sadd.s32 1, %s654_s22  ;;  %s175_s27 = sadd.s32 1, %s646_s20 }
   0x6   : > { %p32_p0 = scmp.ge.s32.totalorder %s30_s26, 2  ;;  %p185_p1 = scmp.ne.s32.totalorder %s646_s20, %s642_s19 }
   0x7   : > { %p186_p2 = scmp.eq.s32.totalorder %s506_s24, 1  ;;  %p191_p3 = scmp.ne.s32.totalorder %s642_s19, %s638_s18 }
   0x8   : > { %s823_s26 = smov (%p32_p0, %s30_s26), 0  ;;  %p192_p5 = scmp.eq.s32.totalorder %s507_s25, 1 }
   0x9   : > { %p732_p4 = por %p186_p2, %p185_p1  ;;  %s170_s29 = ssub.s32 %s654_s22, %s823_s26 }
   0xa   : > { %p510_p6 = scmp.ge.s32.totalorder %s658_s23, 1  ;;  %p173_p7 = scmp.eq.s32.totalorder %s170_s29, 0 }
   0xb   : > { %p739_p8 = por %p192_p5, %p191_p3  ;;  %p252_p9 = scmp.lt.s32.totalorder %s658_s23, 3 }
   0xc   : > { %s745_s6 = scalar_select %p173_p7, %s646_s20, %s175_s27  }
   0xd   : > { %p253_p10 = pnand %p510_p6, %p252_p9 }
   0xe   : > { %p302_p11 = scmp.lt.s32.totalorder (!%p253_p10), %s650_s21, 1  ;;  %s299_s29 = sand.u32 (!%p253_p10), 1, %s642_s19  }
   0xf   : > { %256 = sbr.rel (%p253_p10) target bundleno = 201 (0xc9), region = 40  ;;  %s511_s12 = sshll.u32 (!%p253_p10), %s299_s29, 3 }
  0x10   : > { %s301_s13 = scalar_lea.vmem (!%p253_p10), [#allocation2], %s511_s12 }
  0x14   : > { %v660_v0 = vmov 0   ;;  %s303_s7 = scalar_select %p302_p11, %s650_s21, 1  ;;  %v363_v12 = vlaneseq  ;;  %vm370_vm4 = vcmask 64512  }
  0x15   : > { %577 = vset.pattern.permute.xlu0 %v660_v0 }
  0x16   : > { %s512_s8 = sshll.u32 %s303_s7, 3  ;;  %s328_s17 = scalar_lea.vmem %s813_s4, %s303_s7  ;;  %v364_v13 = vshrl.u32 %v363_v12, 7 }
  0x17   : > { %s308_s11 = scalar_lea.vmem %s809_s0, %s512_s8  ;;  %s325_s14 = scalar_lea.vmem %s812_s3, %s512_s8  ;;  %v355_v3 = vld [vmem:[%s328_s17] sm:$0x1] }
  0x18   : > { %v329_v1 = vld [vmem:[%s308_s11] sm:$0xff]  ;;  %vm356_vm1 = vcmp.eq.f32.partialorder %v355_v3, 0.0  ;;  %s311_s27 = scalar_lea.vmem %s810_s1, %s303_s7  ;;  %s318_s11 = scalar_lea.vmem %s811_s2, %s512_s8  ;;  %v365_v14 = vsub.s32 0, %v364_v13 }
  0x19   : > { %333 = vperm.xlu0 %577, %v329_v1   ;;  %v353_v2 = vld [vmem:[%s325_s14] sm:$0xff]  ;;  %v362_v5 = vsel %vm356_vm1, 1, %v660_v0  ;;  %s518_s7 = sshll.u32 %s650_s21, 7  ;;  %s387_s14 = sshll.u32 %s301_s13, 4  ;;  %s388_s14 = int_to_ptr.vmem [resolvable:$true] %s387_s14 }
  0x1a   : > { %vm354_vm0 = vcmp.eq.f32.partialorder %v353_v2, 0.0  ;;  %v515_v6 = vld [vmem:[%s311_s27] ss:$0 sm:$0xff]  ;;  %v366_v16 = vrot.slane %v362_v5, %v365_v14  ;;  %s769_s8 = scalar_lea.hbm %s814_s5, %s518_s7  ;;  %s373_s17 = scalar_lea.sflag [#allocation3], %s299_s29 }
  0x1b   : > { %v357_v4 = vsel %vm354_vm0, 1, %v660_v0  ;;  %v349_v15 = vld [vmem:[%s318_s11] sm:$0xff]  ;;  %s582_s24 = scalar_lea.vmem %s388_s14, 128  ;;  %s661_s21 = smov [#allocation2]  }
  0x1c   : > { %v351_v18 = vmul.f32 0.4, %v349_v15  ;;  %vm367_vm2 = vcmp.eq.s32.totalorder %v366_v16, 1  ;;  %p583_p12 = scmp.ne.s32.totalorder %s388_s14, %s582_s24  ;;  %s586_s25 = sshll.u32 %s661_s21, 4  ;;  %s587_s25 = int_to_ptr.vmem [resolvable:$false] %s586_s25 }
  0x1d   : > { %359 = vperm.xlu0 %577, %v357_v4   ;;  %s588_s27 = scalar_lea.vmem %s587_s25, 256  ;;  %p589_p1 = scmp.lt.s32.totalorder %s388_s14, %s587_s25 }
  0x1e   : > { %p584_p13 = pnand %p583_p12, %p732_p4  ;;  %p590_p2 = scmp.lt.s32.totalorder %s588_s27, %s582_s24 }
  0x20   : > { %p585_p0 = pneg %p584_p13  ;;  %p591_p3 = por %p590_p2, %p589_p1 }
  0x22   : > { %p592_p5 = pnand %p591_p3, %p585_p0 }
  0x94   : > { %v334_v7 = vpop.permute.xlu0 %333 }
  0x95   : > { %v342_v8 = vadd.f32 %v515_v6, %v334_v7 }
  0x97   : > { %v516_v9 = vmul.f32 -1.442695, %v342_v8 }
  0x98   : > { %v360_v17 = vpop.permute.xlu0 %359 }
  0x99   : > { %578 = vpow2.f32 %v516_v9  ;;  %vm361_vm3 = vcmp.eq.s32.totalorder %v360_v17, 1 }
  0x9a   : > { %vm368_vm5 = vmor %vm361_vm3, %vm367_vm2 }
  0xa6   : > { %v579_v10 = vpop.eup %578 }
  0xa7   : > { %v346_v11 = vadd.f32 1.0, %v579_v10 }
  0xa9   : > { %580 = vrcp.f32 %v346_v11 }
  0xb6   : > { %v581_v19 = vpop.eup %580 }
  0xb7   : > { %v350_v20 = vmul.f32 0.6, %v581_v19 }
  0xb9   : > { %v352_v21 = vadd.f32 %v351_v18, %v350_v20 }
  0xbb   : > { %v369_v22 = vsel %vm368_vm5, 1e-09, %v352_v21 }
  0xbc   : > { %371 = vst.msk [vmem:[%s301_s13] sm:$0xff] %vm370_vm4, %v369_v22 }
  0xbd   : > { %595 = shalt.err (!%p592_p5)
}
  0xbe   : > { %s596_s9 = scalar_lea.hbm %s769_s8, 128  ;;  %s600_s11 = scalar_lea.hbm %s814_s5, 256 }
  0xbf   : > { %p597_p6 = scmp.ne.s32.totalorder %s769_s8, %s596_s9  ;;  %p601_p10 = scmp.lt.s32.totalorder %s769_s8, %s814_s5 }
  0xc0   : > { %p602_p11 = scmp.lt.s32.totalorder %s600_s11, %s596_s9 }
  0xc1   : > { %p598_p7 = pnand %p597_p6, %p732_p4 }
  0xc2   : > { %p603_p12 = por %p602_p11, %p601_p10 }
  0xc3   : > { %p599_p9 = pneg %p598_p7 }
  0xc5   : > { %p604_p13 = pnand %p603_p12, %p599_p9 }
  0xc7   : > { %607 = shalt.err (!%p604_p13)
}
  0xc8   : > { %521 = dma.vmem_to_hbm [thread:$0]  (%p732_p4), %s388_s14, 128, %s769_s8, %s373_s17  }
  0xc9 PF: > { %p527_p0 = scmp.ge.s32.totalorder %s658_s23, 2  ;;  %s399_s13 = sand.u32 1, %s638_s18  }
  0xca   : > { %s400_s15 = scalar_lea.sflag [#allocation3], %s399_s13 }
  0xcb   : > { %p524_p1 = pnand %p527_p0, %p739_p8 }
  0xcd   : > { %p525_p2 = pneg %p524_p1 }
  0xcf   : > { %633 = dma.done.wait (%p525_p2), %s400_s15, 128  }
  0xd0   : > { %635 = vsyncadd (%p525_p2), %s400_s15, 4294967168  ;;  %s18_s23 = sadd.s32 1, %s658_s23   ;;  %s817_s18 = smov %s642_s19 }
  0xd1   : > { %p15_p3 = scmp.ge.s32.totalorder %s18_s23, 4   ;;  %s818_s19 = smov %s646_s20 }
  0xd2   : > { %s819_s20 = smov %s745_s6  ;;  %s820_s21 = smov %s654_s22 }
  0xd3   : > { %s821_s22 = smov %s823_s26  ;;  %17 = sbr.rel (!%p15_p3) target bundleno = 4 (0x4), region = 87 }
  0xd8   :  { %405 = vsyncpa [#allocation3], 1 }
  0xd9   :  { %407 = vsyncpa [#allocation3 + $0x1], 1 }

</bundles_post_ra>
